<compile_context>
chip_gen: v6e
topology: v6e:2x2x1
jax: 0.10.0
libtpu: 0.0.40
codegen_flags: <defaults>
</compile_context>

<pallas_src>
import jax
import jax.numpy as jnp
from jax.experimental import pallas as pl
from jax.experimental.pallas import tpu as pltpu


def _add_kernel(x1_ref, x2_ref, o_ref):
    # Elementwise add on the current VMEM tile (VPU op).
    o_ref[...] = x1_ref[...] + x2_ref[...]


_LANES = 128
# Target per-buffer tile size for the tiled path (~2 MiB). 3 arrays x 2 pipeline
# buffers = ~12 MiB live VMEM: fits the v5e 16 MiB scoped default, well under the
# v7x 64 MiB physical VMEM, and large enough to sit at the HBM roofline.
_TILE_BYTES = 2 * 1024 * 1024
# Below this per-array size a single full-array block (grid=()) beats a tiled
# pipeline: per-grid-step overhead (~0.35 us) would dominate.
_SINGLE_BLOCK_BYTES = 2 * 1024 * 1024


def _sublane_min(dtype):
    # Packed-sublane minimum for the second-minor dim: f32 -> 8, bf16 -> 16, int8 -> 32.
    return max(8, 32 // jnp.dtype(dtype).itemsize)


def _single_block_add(x1_2d, x2_2d):
    # Whole arrays brought into VMEM as one block; no grid, no pipeline.
    return pl.pallas_call(
        _add_kernel,
        out_shape=jax.ShapeDtypeStruct(x1_2d.shape, x1_2d.dtype),
    )(x1_2d, x2_2d)


def _tiled_add(x1_2d, x2_2d, tile_rows):
    rows, cols = x1_2d.shape
    itemsize = jnp.dtype(x1_2d.dtype).itemsize
    tile_bytes = tile_rows * cols * itemsize
    # 3 arrays x 2 pipeline buffers + headroom; explicit so large tiles never hit
    # the (smaller) scoped VMEM default.
    vmem_limit = int(min(6 * tile_bytes + (4 << 20), 64 << 20))
    grid = (pl.cdiv(rows, tile_rows),)  # non-divisible last block is masked by Pallas
    return pl.pallas_call(
        _add_kernel,
        out_shape=jax.ShapeDtypeStruct((rows, cols), x1_2d.dtype),
        grid_spec=pl.GridSpec(
            grid=grid,
            in_specs=[
                pl.BlockSpec((tile_rows, cols), lambda i: (i, 0)),
                pl.BlockSpec((tile_rows, cols), lambda i: (i, 0)),
            ],
            out_specs=pl.BlockSpec((tile_rows, cols), lambda i: (i, 0)),
        ),
        compiler_params=pltpu.CompilerParams(
            dimension_semantics=("parallel",),  # shards rows across both TCs on v7x
            vmem_limit_bytes=vmem_limit,
        ),
    )(x1_2d, x2_2d)


def pallas_add(x1, x2):
    assert x1.shape == x2.shape and x1.dtype == x2.dtype
    orig_shape = x1.shape
    dtype = x1.dtype
    n = x1.size
    itemsize = jnp.dtype(dtype).itemsize
    sublane = _sublane_min(dtype)

    x1_flat = x1.reshape(-1)
    x2_flat = x2.reshape(-1)

    # ---- Small-input path: one full-array block, no grid. ----
    if n * itemsize <= _SINGLE_BLOCK_BYTES:
        cols = _LANES if n >= _LANES else n
        rows = pl.cdiv(n, cols)
        pad = rows * cols - n
        if pad:
            x1_flat = jnp.pad(x1_flat, (0, pad))
            x2_flat = jnp.pad(x2_flat, (0, pad))
        out = _single_block_add(
            x1_flat.reshape(rows, cols), x2_flat.reshape(rows, cols)
        ).reshape(-1)
        if pad:
            out = out[:n]
        return out.reshape(orig_shape)

    # ---- Large-input path: wide lane-dense slab + 1D grid over rows. ----
    # Widest column count (multiple of 128) dividing n -> unmasked full-width stores
    # and few grid steps; pad only if n is not even a multiple of 128.
    cols = 0
    for cand in (32768, 16384, 8192, 4096, 2048, 1024, 512, 256, _LANES):
        if n % cand == 0:
            cols = cand
            break
    if cols == 0:
        cols = _LANES
    rows = pl.cdiv(n, cols)
    pad = rows * cols - n
    if pad:
        x1_flat = jnp.pad(x1_flat, (0, pad))
        x2_flat = jnp.pad(x2_flat, (0, pad))
    x1_2d = x1_flat.reshape(rows, cols)
    x2_2d = x2_flat.reshape(rows, cols)

    # Per-buffer tile ~_TILE_BYTES, rounded to the packed sublane minimum.
    tile_rows = max(sublane, (_TILE_BYTES // (cols * itemsize)) // sublane * sublane)
    tile_rows = min(tile_rows, max(sublane, (rows // sublane) * sublane))

    out = _tiled_add(x1_2d, x2_2d, tile_rows).reshape(-1)
    if pad:
        out = out[:n]
    return out.reshape(orig_shape)


if __name__ == "__main__":
    key = jax.random.PRNGKey(0)
    k1, k2 = jax.random.split(key)
    # Small shapes consistent with the module: batch=2, channels=4, spatial=16x16.
    shape = (2, 4, 16, 16)
    x1 = jax.random.normal(k1, shape, dtype=jnp.float32)
    x2 = jax.random.normal(k2, shape, dtype=jnp.float32)

    out = pallas_add(x1, x2)
    out = jax.block_until_ready(out)

    # Correctness check against plain JAX reference.
    ref = x1 + x2
    assert out.shape == ref.shape and out.dtype == ref.dtype
    assert jnp.allclose(out, ref), "mismatch vs reference"

    # Also exercise the tiled (large-input) path once to validate the grid code.
    big_shape = (8, 64, 64, 64)  # 2M elements = 8 MiB f32 -> tiled path
    b1 = jax.random.normal(k1, big_shape, dtype=jnp.float32)
    b2 = jax.random.normal(k2, big_shape, dtype=jnp.float32)
    big_out = jax.block_until_ready(pallas_add(b1, b2))
    assert jnp.allclose(big_out, b1 + b2), "mismatch vs reference (tiled path)"

    print("KERNEL_OK")
</pallas_src>

<mosaic_0001>
module attributes {stable_mosaic.version = 11 : i64} {
  func.func @_add_kernel(%arg0: memref<16x128xf32, #tpu.memory_space<vmem>>, %arg1: memref<16x128xf32, #tpu.memory_space<vmem>>, %arg2: memref<16x128xf32, #tpu.memory_space<vmem>>) attributes {dimension_semantics = [], scalar_prefetch = 0 : i64, scratch_operands = 0 : i64, tpu.core_type = #tpu.core_type<tc>} {
    %c0 = arith.constant 0 : index
    %c0_0 = arith.constant 0 : index
    %0 = vector.load %arg0[%c0, %c0_0] : memref<16x128xf32, #tpu.memory_space<vmem>>, vector<16x128xf32>
    %c0_1 = arith.constant 0 : index
    %c0_2 = arith.constant 0 : index
    %1 = vector.load %arg1[%c0_1, %c0_2] : memref<16x128xf32, #tpu.memory_space<vmem>>, vector<16x128xf32>
    %2 = arith.addf %0, %1 : vector<16x128xf32>
    %c0_3 = arith.constant 0 : index
    %c0_4 = arith.constant 0 : index
    %3 = vector.load %arg2[%c0_3, %c0_4] : memref<16x128xf32, #tpu.memory_space<vmem>>, vector<16x128xf32>
    tpu.vector_store %arg2[%c0_3, %c0_4], %2 {strides = array<i32>} : memref<16x128xf32, #tpu.memory_space<vmem>>, vector<16x128xf32>,
    return
  }
}

</mosaic_0001>

<bundles_post_ra>
// kernel: tpu_custom_call.1
= control target key start
LH: loop header
LB: loop body
LE: loop exit
PB: predicated region body
PF: predicated region fallthrough
CT: control target
= control target key end

     0   :  { %7 = vsyncpa [#allocation3], 0  ;;  %s175_s0 = inlined_call_operand.hbm [shape: f32[16,128], index: 0, kind: input, shape index: {}]   ;;  %s176_s1 = inlined_call_operand.hbm [shape: f32[16,128], index: 1, kind: input, shape index: {}]   ;;  %s177_s2 = inlined_call_operand.hbm [shape: f32[16,128], index: 2, kind: output, shape index: {}]  }
   0x1   :  { %8 = vsyncpa [#allocation6], 0 }
   0x2   :  { %9 = vsyncpa [#allocation4], 0  ;;  %s137_s9 = smov [#allocation2]  }
   0x3   :  { %s15_s10 = sshll.u32 %s137_s9, 4  ;;  %s16_s10 = int_to_ptr.vmem [resolvable:$true] %s15_s10 }
   0x4   :  { %s79_s11 = scalar_lea.vmem %s16_s10, 256  ;;  %p84_p1 = scmp.lt.s32.totalorder %s16_s10, %s16_s10 }
   0x5   :  { %p80_p0 = scmp.ne.s32.totalorder %s16_s10, %s79_s11  ;;  %p85_p2 = scmp.lt.s32.totalorder %s79_s11, %s79_s11 }
   0x7   :  { %p86_p3 = por %p85_p2, %p84_p1 }
   0x9   :  { %p87_p4 = pnand %p86_p3, %p80_p0 }
   0xb   :  { %90 = shalt.err (!%p87_p4)
}
   0xc   :  { %s138_s12 = smov 128   ;;  %s139_s13 = smov 8  }
   0xd   :  { %21 = dma.hbm_to_vmem [thread:$0]  %s175_s0, 256, %s16_s10, [#allocation3], %s138_s12, %s138_s12, %s139_s13  }
   0xe   :  { %s140_s16 = smov [#allocation5]  }
   0xf   :  { %s27_s17 = sshll.u32 %s140_s16, 4  ;;  %s28_s17 = int_to_ptr.vmem [resolvable:$true] %s27_s17 }
  0x10   :  { %s99_s18 = scalar_lea.vmem %s28_s17, 256  ;;  %p104_p6 = scmp.lt.s32.totalorder %s28_s17, %s28_s17 }
  0x11   :  { %p100_p5 = scmp.ne.s32.totalorder %s28_s17, %s99_s18  ;;  %p105_p7 = scmp.lt.s32.totalorder %s99_s18, %s99_s18 }
  0x13   :  { %p106_p8 = por %p105_p7, %p104_p6 }
  0x15   :  { %p107_p9 = pnand %p106_p8, %p100_p5 }
  0x17   :  { %110 = shalt.err (!%p107_p9)
}
  0x18   :  { %33 = dma.hbm_to_vmem [thread:$0]  %s176_s1, 256, %s28_s17, [#allocation6], %s138_s12, %s138_s12, %s139_s13  }
  0x19   :  { %131 = dma.done.wait [#allocation3], 256  }
  0x1a   :  { %132 = vsyncadd [#allocation3], 4294967040 }
  0x1b   :  { %133 = dma.done.wait [#allocation6], 256  }
  0x1c   :  { %134 = vsyncadd [#allocation6], 4294967040  ;;  %s141_s0 = smov [#allocation7]   ;;  %v40_v0 = vld [vmem:[#allocation2] sm:$0xff]  ;;  %v42_v1 = vld [vmem:[#allocation5] sm:$0xff] }
  0x1d   :  { %s53_s21 = sshll.u32 %s141_s0, 4  ;;  %v41_v2 = vld [vmem:[#allocation2 + $0x8] sm:$0xff]  ;;  %v44_v3 = vadd.f32 %v42_v1, %v40_v0  ;;  %v43_v4 = vld [vmem:[#allocation5 + $0x8] sm:$0xff]  ;;  %s54_s21 = int_to_ptr.vmem [resolvable:$true] %s53_s21 }
  0x1e   :  { %v45_v5 = vadd.f32 %v43_v4, %v41_v2  ;;  %s111_s22 = scalar_lea.vmem %s54_s21, 256  ;;  %p116_p11 = scmp.lt.s32.totalorder %s54_s21, %s54_s21 }
  0x1f   :  { %46 = vst [vmem:[#allocation7] sm:$0xff] %v44_v3  ;;  %p112_p10 = scmp.ne.s32.totalorder %s54_s21, %s111_s22  ;;  %p117_p12 = scmp.lt.s32.totalorder %s111_s22, %s111_s22 }
  0x20   :  { %47 = vst [vmem:[#allocation7 + $0x8] sm:$0xff] %v45_v5 }
  0x21   :  { %p118_p13 = por %p117_p12, %p116_p11 }
  0x23   :  { %p119_p0 = pnand %p118_p13, %p112_p10 }
  0x25   :  { %122 = shalt.err (!%p119_p0)
}
  0x26   :  { %59 = dma.vmem_to_hbm [thread:$0]  %s54_s21, 256, %s177_s2, [#allocation4], %s138_s12, %s138_s12, %s139_s13  }
  0x27   :  { %135 = dma.done.wait [#allocation4], 256  }
  0x28   :  { %136 = vsyncadd [#allocation4], 4294967040 }
  0x29   :  { %63 = vsyncpa [#allocation3], 1 }
  0x2a   :  { %64 = vsyncpa [#allocation6], 1 }
  0x2b   :  { %65 = vsyncpa [#allocation4], 1 }

</bundles_post_ra>
